<compile_context>
chip_gen: v5e
topology: v5e:2x2
jax: 0.10.0
libtpu: 0.0.40
codegen_flags: <defaults>
</compile_context>

<pallas_src>
import jax
import jax.numpy as jnp
from jax.experimental import pallas as pl
from jax.experimental.pallas import tpu as pltpu

BN_EPS = 1e-5
LANE = 128


def classblock_kernel(x_ref, w1_ref, b1_ref, w2_ref, b2_ref, out_ref):
    """One PCB part classifier per grid step.

    x_ref : (B, D_in)    f32
    w1_ref: (D_in, D_bn) bf16  (BN scale folded in)
    b1_ref: (1, D_bn)    f32   (BN shift folded in)
    w2_ref: (D_bn, Cp)   bf16  (zero-padded to lane-dense Cp)
    b2_ref: (1, Cp)      f32
    out   : (B, Cp)      f32
    """
    # Bottleneck Linear (+ folded BN): bf16 MXU inputs, f32 accumulation.
    h = jnp.dot(x_ref[...].astype(jnp.bfloat16), w1_ref[...],
                preferred_element_type=jnp.float32)
    h = h + b1_ref[...]

    # Classifier Linear: (B, D_bn) @ (D_bn, Cp) -> (B, Cp), lane-dense store.
    out = jnp.dot(h.astype(jnp.bfloat16), w2_ref[...],
                  preferred_element_type=jnp.float32)
    out_ref[...] = (out + b2_ref[...]).astype(out_ref.dtype)


def pcb_part_classifiers(x_parts, params, class_num):
    """Run all PCB part ClassBlocks in one pallas_call.

    x_parts: (P, B, D_in) f32 pooled part features (one row-block per part).
    Returns (P, B, class_num) f32 logits.
    """
    P, B, D_in = x_parts.shape
    D_bn = params["w1f_t"].shape[-1]
    Cp = params["w2p_t"].shape[-1]

    operands = (x_parts, params["w1f_t"], params["b1f"],
                params["w2p_t"], params["b2p"])

    flops = 2 * P * B * (D_in * D_bn + D_bn * Cp)
    bytes_accessed = sum(int(a.size) * a.dtype.itemsize for a in operands)
    bytes_accessed += P * B * Cp * 4  # output

    out = pl.pallas_call(
        classblock_kernel,
        out_shape=jax.ShapeDtypeStruct((P, B, Cp), jnp.float32),
        grid=(P,),
        in_specs=[
            pl.BlockSpec((pl.Squeezed(), B, D_in), lambda p: (p, 0, 0)),
            pl.BlockSpec((pl.Squeezed(), D_in, D_bn), lambda p: (p, 0, 0)),
            pl.BlockSpec((pl.Squeezed(), 1, D_bn), lambda p: (p, 0, 0)),
            pl.BlockSpec((pl.Squeezed(), D_bn, Cp), lambda p: (p, 0, 0)),
            pl.BlockSpec((pl.Squeezed(), 1, Cp), lambda p: (p, 0, 0)),
        ],
        out_specs=pl.BlockSpec((pl.Squeezed(), B, Cp), lambda p: (p, 0, 0)),
        compiler_params=pltpu.CompilerParams(
            dimension_semantics=("parallel",)),
        cost_estimate=pl.CostEstimate(
            flops=flops, transcendentals=0, bytes_accessed=bytes_accessed),
    )(*operands)

    return out[:, :, :class_num]


def init_params(key, P, input_dim, num_bottleneck, class_num):
    """PyTorch-equivalent init for P ClassBlocks + kernel-side preprocessing."""
    k1, k2, k3, k4, k5 = jax.random.split(key, 5)
    # Linear1: kaiming_normal fan_out -> std = sqrt(2 / fan_out); default bias.
    w1 = jax.random.normal(k1, (P, num_bottleneck, input_dim),
                           jnp.float32) * jnp.sqrt(2.0 / num_bottleneck)
    b1 = (jax.random.uniform(k2, (P, num_bottleneck), jnp.float32) - 0.5) * (
        2.0 / jnp.sqrt(input_dim))
    # BatchNorm1d: weight ~ N(1, 0.02), bias = 0, running stats (0, 1).
    gamma = 1.0 + 0.02 * jax.random.normal(k3, (P, num_bottleneck), jnp.float32)
    beta = jnp.zeros((P, num_bottleneck), jnp.float32)
    running_mean = jnp.zeros((P, num_bottleneck), jnp.float32)
    running_var = jnp.ones((P, num_bottleneck), jnp.float32)
    # Classifier Linear: weight ~ N(0, 0.001), default (uniform) bias init.
    w2 = 0.001 * jax.random.normal(k4, (P, class_num, num_bottleneck),
                                   jnp.float32)
    b2 = (jax.random.uniform(k5, (P, class_num), jnp.float32) - 0.5) * (
        2.0 / jnp.sqrt(num_bottleneck))

    raw = dict(w1=w1, b1=b1, gamma=gamma, beta=beta,
               rmean=running_mean, rvar=running_var, w2=w2, b2=b2)

    # --- Fold eval-mode BatchNorm (per-feature affine) into Linear1 ---
    scale = gamma * jax.lax.rsqrt(running_var + BN_EPS)          # (P, D_bn)
    w1f_t = jnp.transpose(w1, (0, 2, 1)) * scale[:, None, :]     # (P, D_in, D_bn)
    b1f = (b1 - running_mean) * scale + beta                     # (P, D_bn)

    # --- Pad classifier output dim to a lane-dense multiple of 128 ---
    Cp = ((class_num + LANE - 1) // LANE) * LANE
    w2_t = jnp.transpose(w2, (0, 2, 1))                          # (P, D_bn, C)
    w2p_t = jnp.pad(w2_t, ((0, 0), (0, 0), (0, Cp - class_num)))
    b2p = jnp.pad(b2, ((0, 0), (0, Cp - class_num)))

    params = {
        "w1f_t": w1f_t.astype(jnp.bfloat16),   # (P, D_in, D_bn) bf16
        "b1f": b1f[:, None, :],                # (P, 1, D_bn)    f32
        "w2p_t": w2p_t.astype(jnp.bfloat16),   # (P, D_bn, Cp)   bf16
        "b2p": b2p[:, None, :],                # (P, 1, Cp)      f32
    }
    return params, raw


def class_block_ref(x_parts, raw):
    """Pure-f32 JAX reference matching the PyTorch eval-mode ClassBlock."""
    h = jnp.einsum("pbi,poi->pbo", x_parts, raw["w1"]) + raw["b1"][:, None, :]
    hn = (h - raw["rmean"][:, None, :]) / jnp.sqrt(
        raw["rvar"][:, None, :] + BN_EPS)
    hn = hn * raw["gamma"][:, None, :] + raw["beta"][:, None, :]
    return jnp.einsum("pbo,pco->pbc", hn, raw["w2"]) + raw["b2"][:, None, :]


if __name__ == "__main__":
    # Small shapes consistent with PCB (part=4 ClassBlock heads).
    P, B, INPUT_DIM, NUM_BOTTLENECK, CLASS_NUM = 4, 8, 64, 128, 16

    key = jax.random.PRNGKey(0)
    kx, kp = jax.random.split(key)
    x_parts = jax.random.normal(kx, (P, B, INPUT_DIM), jnp.float32)
    params, raw = init_params(kp, P, INPUT_DIM, NUM_BOTTLENECK, CLASS_NUM)

    out = pcb_part_classifiers(x_parts, params, CLASS_NUM)
    jax.block_until_ready(out)

    ref = class_block_ref(x_parts, raw)
    assert out.shape == (P, B, CLASS_NUM)
    # bf16 matmul inputs with f32 accumulation -> loose tolerance vs f32 ref.
    assert jnp.allclose(out, ref, atol=2e-3, rtol=5e-2), "mismatch vs reference"

    print("KERNEL_OK")
</pallas_src>

<mosaic_0001>
module attributes {stable_mosaic.version = 11 : i64} {
  func.func @classblock_kernel(%arg0: i32, %arg1: memref<1x8x64xf32, #tpu.memory_space<vmem>>, %arg2: memref<1x64x128xbf16, #tpu.memory_space<vmem>>, %arg3: memref<1x1x128xf32, #tpu.memory_space<vmem>>, %arg4: memref<1x128x128xbf16, #tpu.memory_space<vmem>>, %arg5: memref<1x1x128xf32, #tpu.memory_space<vmem>>, %arg6: memref<1x8x128xf32, #tpu.memory_space<vmem>>) attributes {dimension_semantics = [#tpu.dimension_semantics<parallel>], iteration_bounds = array<i64: 4>, scalar_prefetch = 0 : i64, scratch_operands = 0 : i64, tpu.core_type = #tpu.core_type<tc>, window_params = [{transform_indices = @transform_0, window_bounds = array<i64: 1, 8, 64>}, {transform_indices = @transform_1, window_bounds = array<i64: 1, 64, 128>}, {transform_indices = @transform_2, window_bounds = array<i64: 1, 1, 128>}, {transform_indices = @transform_3, window_bounds = array<i64: 1, 128, 128>}, {transform_indices = @transform_4, window_bounds = array<i64: 1, 1, 128>}, {transform_indices = @transform_5, window_bounds = array<i64: 1, 8, 128>}]} {
    %c0 = arith.constant 0 : index
    %c0_0 = arith.constant 0 : index
    %c0_1 = arith.constant 0 : index
    %0 = vector.load %arg1[%c0, %c0_0, %c0_1] : memref<1x8x64xf32, #tpu.memory_space<vmem>>, vector<1x8x64xf32>
    %1 = vector.shape_cast %0 : vector<1x8x64xf32> to vector<8x64xf32>
    %2 = arith.truncf %1 : vector<8x64xf32> to vector<8x64xbf16>
    %c0_2 = arith.constant 0 : index
    %c0_3 = arith.constant 0 : index
    %c0_4 = arith.constant 0 : index
    %3 = vector.load %arg2[%c0_2, %c0_3, %c0_4] : memref<1x64x128xbf16, #tpu.memory_space<vmem>>, vector<1x64x128xbf16>
    %4 = vector.shape_cast %3 : vector<1x64x128xbf16> to vector<64x128xbf16>
    %cst = arith.constant dense<0.000000e+00> : vector<8x128xf32>
    %5 = tpu.matmul %2, %4, %cst {dimension_numbers = #tpu.dot_dimension_numbers<[1], [0], [0], [1], [0, 0, 1, 1], [], []>} : vector<8x64xbf16>, vector<64x128xbf16>, vector<8x128xf32> -> vector<8x128xf32>
    %c0_5 = arith.constant 0 : index
    %c0_6 = arith.constant 0 : index
    %c0_7 = arith.constant 0 : index
    %6 = vector.load %arg3[%c0_5, %c0_6, %c0_7] : memref<1x1x128xf32, #tpu.memory_space<vmem>>, vector<1x1x128xf32>
    %7 = vector.shape_cast %6 : vector<1x1x128xf32> to vector<1x128xf32>
    %8 = vector.broadcast %7 : vector<1x128xf32> to vector<8x128xf32>
    %9 = arith.addf %5, %8 : vector<8x128xf32>
    %10 = arith.truncf %9 : vector<8x128xf32> to vector<8x128xbf16>
    %c0_8 = arith.constant 0 : index
    %c0_9 = arith.constant 0 : index
    %c0_10 = arith.constant 0 : index
    %11 = vector.load %arg4[%c0_8, %c0_9, %c0_10] : memref<1x128x128xbf16, #tpu.memory_space<vmem>>, vector<1x128x128xbf16>
    %12 = vector.shape_cast %11 : vector<1x128x128xbf16> to vector<128x128xbf16>
    %cst_11 = arith.constant dense<0.000000e+00> : vector<8x128xf32>
    %13 = tpu.matmul %10, %12, %cst_11 {dimension_numbers = #tpu.dot_dimension_numbers<[1], [0], [0], [1], [0, 0, 1, 1], [], []>} : vector<8x128xbf16>, vector<128x128xbf16>, vector<8x128xf32> -> vector<8x128xf32>
    %c0_12 = arith.constant 0 : index
    %c0_13 = arith.constant 0 : index
    %c0_14 = arith.constant 0 : index
    %14 = vector.load %arg5[%c0_12, %c0_13, %c0_14] : memref<1x1x128xf32, #tpu.memory_space<vmem>>, vector<1x1x128xf32>
    %15 = vector.shape_cast %14 : vector<1x1x128xf32> to vector<1x128xf32>
    %16 = vector.broadcast %15 : vector<1x128xf32> to vector<8x128xf32>
    %17 = arith.addf %13, %16 : vector<8x128xf32>
    %c0_15 = arith.constant 0 : index
    %c0_16 = arith.constant 0 : index
    %c0_17 = arith.constant 0 : index
    %18 = vector.load %arg6[%c0_15, %c0_16, %c0_17] : memref<1x8x128xf32, #tpu.memory_space<vmem>>, vector<1x8x128xf32>
    %19 = vector.shape_cast %18 : vector<1x8x128xf32> to vector<8x128xf32>
    %20 = vector.shape_cast %17 : vector<8x128xf32> to vector<1x8x128xf32>
    tpu.vector_store %arg6[%c0_15, %c0_16, %c0_17], %20 {strides = array<i32>} : memref<1x8x128xf32, #tpu.memory_space<vmem>>, vector<1x8x128xf32>,
    return
  }
  func.func @transform_0(%arg0: i32) -> (i32, i32, i32) {
    %c0_i32 = arith.constant 0 : i32
    %c0_i32_0 = arith.constant 0 : i32
    %c0_i32_1 = arith.constant 0 : i32
    return %arg0, %c0_i32, %c0_i32_0 : i32, i32, i32
  }
  func.func @transform_1(%arg0: i32) -> (i32, i32, i32) {
    %c0_i32 = arith.constant 0 : i32
    %c0_i32_0 = arith.constant 0 : i32
    %c0_i32_1 = arith.constant 0 : i32
    return %arg0, %c0_i32, %c0_i32_0 : i32, i32, i32
  }
  func.func @transform_2(%arg0: i32) -> (i32, i32, i32) {
    %c0_i32 = arith.constant 0 : i32
    %c0_i32_0 = arith.constant 0 : i32
    %c0_i32_1 = arith.constant 0 : i32
    return %arg0, %c0_i32, %c0_i32_0 : i32, i32, i32
  }
  func.func @transform_3(%arg0: i32) -> (i32, i32, i32) {
    %c0_i32 = arith.constant 0 : i32
    %c0_i32_0 = arith.constant 0 : i32
    %c0_i32_1 = arith.constant 0 : i32
    return %arg0, %c0_i32, %c0_i32_0 : i32, i32, i32
  }
  func.func @transform_4(%arg0: i32) -> (i32, i32, i32) {
    %c0_i32 = arith.constant 0 : i32
    %c0_i32_0 = arith.constant 0 : i32
    %c0_i32_1 = arith.constant 0 : i32
    return %arg0, %c0_i32, %c0_i32_0 : i32, i32, i32
  }
  func.func @transform_5(%arg0: i32) -> (i32, i32, i32) {
    %c0_i32 = arith.constant 0 : i32
    %c0_i32_0 = arith.constant 0 : i32
    %c0_i32_1 = arith.constant 0 : i32
    return %arg0, %c0_i32, %c0_i32_0 : i32, i32, i32
  }
}

</mosaic_0001>

<bundles_post_ra>
// kernel: tpu_custom_call.1
= control target key start
LH: loop header
LB: loop body
LE: loop exit
PB: predicated region body
PF: predicated region fallthrough
CT: control target
= control target key end

     0   :  { %s1335_s0 = inlined_call_operand.hbm [shape: f32[4,8,64], index: 0, kind: input, shape index: {}]   ;;  %s1336_s1 = inlined_call_operand.hbm [shape: bf16[4,64,128], index: 1, kind: input, shape index: {}]   ;;  %s1337_s2 = inlined_call_operand.hbm [shape: f32[4,1,128], index: 2, kind: input, shape index: {}]   ;;  %s1338_s3 = inlined_call_operand.hbm [shape: bf16[4,128,128], index: 3, kind: input, shape index: {}]   ;;  %s1339_s4 = inlined_call_operand.hbm [shape: f32[4,1,128], index: 4, kind: input, shape index: {}]   ;;  %s1340_s5 = inlined_call_operand.hbm [shape: f32[4,8,128], index: 5, kind: output, shape index: {}]  }
   0x1   :  { %1348 = sst [smem:[#allocation20_spill]] %s1336_s1 }
   0x2   :  { %1349 = sst [smem:[#allocation21_spill]] %s1338_s3 }
   0x3   :  { %10 = vsyncpa [#allocation3], 0 }
   0x4   :  { %12 = vsyncpa [#allocation3 + $0x1], 0 }
   0x5   :  { %13 = vsyncpa [#allocation6], 0 }
   0x6   :  { %15 = vsyncpa [#allocation6 + $0x1], 0 }
   0x7   :  { %16 = vsyncpa [#allocation9], 0 }
   0x8   :  { %18 = vsyncpa [#allocation9 + $0x1], 0 }
   0x9   :  { %19 = vsyncpa [#allocation4], 0 }
   0xa   :  { %21 = vsyncpa [#allocation4 + $0x1], 0  ;;  %s1104_s18 = smov 0   ;;  %s1106_s19 = smov 0  }
   0xb   :  { %s1108_s20 = smov 0   ;;  %s1110_s21 = smov 0  }
   0xc LB: > { %1350 = sst [smem:[#allocation16_spill]] %s1066_s20  ;;  %s1125_s22 = sadd.s32 4294967295, %s1070_s21   ;;  %s1070_s21 = sphi %s1110_s21, %s1366_s21   ;;  %s1066_s20 = sphi %s1108_s20, %s1368_s20   ;;  %s1062_s19 = sphi %s1106_s19, %s1370_s19   ;;  %s1058_s18 = sphi %s1104_s18, %s1369_s18  }
   0xd   : > { %s693_s23 = sadd.s32 4294967294, %s1070_s21   ;;  %s1129_s24 = sadd.s32 1, %s1070_s21  }
   0xe   : > { %1351 = sst [smem:[#allocation17_spill]] %s1129_s24  ;;  %s34_s25 = sadd.s32 1, %s1066_s20 }
   0xf   : > { %s31_s26 = ssub.s32 %s1070_s21, %s1129_s24  ;;  %p41_p0 = scmp.ne.s32.totalorder %s1066_s20, %s1062_s19 }
  0x10   : > { %p32_p1 = scmp.eq.s32.totalorder %s31_s26, 0  ;;  %p42_p2 = scmp.eq.s32.totalorder %s1070_s21, 0 }
  0x11   : > { %p47_p3 = scmp.ne.s32.totalorder %s1062_s19, %s1058_s18  ;;  %p48_p4 = scmp.eq.s32.totalorder %s1125_s22, 0 }
  0x12   : > { %s1141_s27 = scalar_select %p32_p1, %s1066_s20, %s34_s25  }
  0x13   : > { %p43_p5 = por %p42_p2, %p41_p0  ;;  %p1143_p6 = por %p48_p4, %p47_p3 }
  0x14   : > { %1352 = sst [smem:[#allocation18_spill]] %s1141_s27  ;;  %p175_p7 = scmp.eq.s32.totalorder %s1125_s22, 3 }
  0x15   : > { %p181_p8 = scmp.eq.s32.totalorder %s693_s23, 3  ;;  %p808_p9 = scmp.lt.s32.totalorder %s1070_s21, 4 }
  0x16   : > { %p1149_p10 = por %p175_p7, %p41_p0  ;;  %s1158_s6 = sand.u32 1, %s1066_s20  }
  0x17   : > { %p1153_p11 = por %p181_p8, %p47_p3  ;;  %p1160_p12 = pnand %p808_p9, %p43_p5 }
  0x18   : > { %s1341_s8 = sand.u32 1, %s1070_s21   ;;  %s698_s9 = sshll.u32 %s1158_s6, 5 }
  0x19   : > { %s1355_s30 = scalar_select %p1153_p11, 1, 0 }
  0x1a   : > { %s762_s10 = sshll.u32 %s1070_s21, 5  ;;  %s1358_s1 = sld [smem:[#allocation20_spill]] }
  0x1b   : > { %1356 = sst [smem:[#allocation19_spill]] %s1355_s30  ;;  %s224_s14 = scalar_lea.vmem [#allocation5], %s698_s9 }
  0x1c   : > { %s232_s15 = sshll.u32 %s224_s14, 4  ;;  %p704_p13 = scmp.ge.s32.totalorder %s1070_s21, 1  ;;  %s233_s15 = int_to_ptr.vmem [resolvable:$true] %s232_s15 }
  0x1d   : > { %s1173_s17 = scalar_lea.sflag [#allocation6], %s1341_s8  ;;  %p1177_p1 = pneg %p1160_p12 }
  0x20   : > { %s229_s13 = scalar_lea.hbm %s1358_s1, %s762_s10  ;;  %s853_s11 = scalar_lea.hbm %s1358_s1, 128 }
  0x21   : > { %s230_s16 = sshll.u32 %s229_s13, 4  ;;  %s231_s16 = int_to_ptr.hbm [resolvable:$true] %s230_s16 }
  0x22   : > { %s846_s23 = sshra.s32 %s231_s16, 4  ;;  %s847_s23 = int_to_ptr.hbm [resolvable:$true] %s846_s23 }
  0x23   : > { %s848_s25 = scalar_lea.hbm %s847_s23, 32  ;;  %p854_p4 = scmp.lt.s32.totalorder %s847_s23, %s1358_s1 }
  0x24   : > { %p849_p0 = scmp.ne.s32.totalorder %s847_s23, %s848_s25  ;;  %p855_p5 = scmp.lt.s32.totalorder %s853_s11, %s848_s25 }
  0x26   : > { %p851_p2 = pnand %p1177_p1, %p849_p0  ;;  %p856_p7 = por %p855_p5, %p854_p4 }
  0x28   : > { %p852_p3 = pneg %p851_p2 }
  0x2a   : > { %p857_p8 = pnand %p856_p7, %p852_p3 }
  0x2c   : > { %860 = shalt.err (!%p857_p8)
}
  0x2d   : > { %s1343_s14 = smov 64   ;;  %s1344_s8 = smov 4  }
  0x2e   : > { %794 = dma.hbm_to_vmem [thread:$0]  (!%p1160_p12), %s231_s16, 512, %s233_s15, %s1173_s17, %s1343_s14, %s1343_s14, %s1344_s8  }
  0x2f   : > { %p296_p9 = scmp.lt.s32.totalorder %s1070_s21, 5  ;;  %s701_s23 = sshll.u32 %s1158_s6, 6 }
  0x30   : > { %s763_s25 = sshll.u32 %s1070_s21, 6  ;;  %s1361_s3 = sld [smem:[#allocation21_spill]] }
  0x31   : > { %p1200_p0 = pnand %p704_p13, %p296_p9  ;;  %s263_s13 = scalar_lea.vmem [#allocation8], %s701_s23 }
  0x32   : > { %s271_s1 = sshll.u32 %s263_s13, 4  ;;  %s1362_s20 = sand.u32 1, %s1070_s21   ;;  %s272_s1 = int_to_ptr.vmem [resolvable:$true] %s271_s1 }
  0x33   : > { %s1209_s15 = scalar_lea.sflag [#allocation9], %s1362_s20 }
  0x36   : > { %s268_s12 = scalar_lea.hbm %s1361_s3, %s763_s25  ;;  %s883_s10 = scalar_lea.hbm %s1361_s3, 256 }
  0x37   : > { %s269_s27 = sshll.u32 %s268_s12, 4  ;;  %s270_s27 = int_to_ptr.hbm [resolvable:$true] %s269_s27 }
  0x38   : > { %s876_s16 = sshra.s32 %s270_s27, 4  ;;  %s877_s16 = int_to_ptr.hbm [resolvable:$true] %s876_s16 }
  0x39   : > { %s878_s14 = scalar_lea.hbm %s877_s16, 64  ;;  %p884_p4 = scmp.lt.s32.totalorder %s877_s16, %s1361_s3 }
  0x3a   : > { %p879_p2 = scmp.ne.s32.totalorder %s877_s16, %s878_s14  ;;  %p885_p5 = scmp.lt.s32.totalorder %s883_s10, %s878_s14 }
  0x3c   : > { %p881_p13 = pnand %p879_p2, %p1177_p1  ;;  %p886_p7 = por %p885_p5, %p884_p4 }
  0x3e   : > { %p882_p3 = pneg %p881_p13 }
  0x40   : > { %p887_p8 = pnand %p886_p7, %p882_p3 }
  0x42   : > { %890 = shalt.err (!%p887_p8)
}
  0x43   : > { %s1363_s20 = smov 4   ;;  %s1364_s11 = smov 64  }
  0x44   : > { %800 = dma.hbm_to_vmem [thread:$0]  (!%p1160_p12), %s270_s27, 1024, %s272_s1, %s1209_s15, %s1364_s11, %s1364_s11, %s1363_s20  }
  0x45   : > { %s696_s24 = sshll.u32 %s1158_s6, 3  ;;  %s697_s8 = sshll.u32 %s1070_s21, 3 }
  0x46   : > { %s209_s14 = scalar_lea.hbm %s1335_s0, %s697_s8  ;;  %s205_s10 = scalar_lea.vmem [#allocation2], %s696_s24 }
  0x47   : > { %s211_s16 = sshll.u32 %s209_s14, 4  ;;  %s213_s25 = sshll.u32 %s205_s10, 4  ;;  %s212_s16 = int_to_ptr.hbm [resolvable:$true] %s211_s16  ;;  %s214_s25 = int_to_ptr.vmem [resolvable:$true] %s213_s25 }
  0x48   : > { %s202_s23 = scalar_lea.sflag [#allocation3], %s1158_s6  ;;  %s906_s3 = sshra.s32 %s212_s16, 4  ;;  %s907_s3 = int_to_ptr.hbm [resolvable:$true] %s906_s3 }
  0x49   : > { %s908_s30 = scalar_lea.hbm %s907_s3, 8  ;;  %s913_s20 = scalar_lea.hbm %s1335_s0, 32 }
  0x4a   : > { %p909_p9 = scmp.ne.s32.totalorder %s907_s3, %s908_s30  ;;  %p914_p3 = scmp.lt.s32.totalorder %s907_s3, %s1335_s0 }
  0x4b   : > { %p915_p4 = scmp.lt.s32.totalorder %s913_s20, %s908_s30 }
  0x4c   : > { %p911_p2 = pnand %p909_p9, %p1177_p1 }
  0x4d   : > { %p916_p5 = por %p915_p4, %p914_p3 }
  0x4e   : > { %p912_p13 = pneg %p911_p2 }
  0x50   : > { %p917_p7 = pnand %p916_p5, %p912_p13 }
  0x52   : > { %920 = shalt.err (!%p917_p7)
}
  0x53   : > { %791 = dma.hbm_to_vmem [thread:$0]  (!%p1160_p12), %s212_s16, 128, %s214_s25, %s202_s23  }
  0x54   : > { %s248_s13 = scalar_lea.hbm %s1337_s2, %s1070_s21  ;;  %s245_s10 = scalar_lea.vmem [#allocation7], %s1158_s6 }
  0x55   : > { %s250_s14 = sshll.u32 %s248_s13, 4  ;;  %s252_s1 = sshll.u32 %s245_s10, 4  ;;  %s251_s14 = int_to_ptr.hbm [resolvable:$true] %s250_s14  ;;  %s253_s1 = int_to_ptr.vmem [resolvable:$true] %s252_s1 }
  0x56   : > { %s936_s3 = sshra.s32 %s251_s14, 4  ;;  %s943_s16 = scalar_lea.hbm %s1337_s2, 4  ;;  %s937_s3 = int_to_ptr.hbm [resolvable:$true] %s936_s3 }
  0x57   : > { %s938_s30 = scalar_lea.hbm %s937_s3, 1  ;;  %p944_p13 = scmp.lt.s32.totalorder %s937_s3, %s1337_s2 }
  0x58   : > { %p939_p8 = scmp.ne.s32.totalorder %s937_s3, %s938_s30  ;;  %p945_p3 = scmp.lt.s32.totalorder %s943_s16, %s938_s30 }
  0x5a   : > { %p941_p9 = pnand %p939_p8, %p1177_p1  ;;  %p946_p4 = por %p945_p3, %p944_p13 }
  0x5c   : > { %p942_p2 = pneg %p941_p9 }
  0x5e   : > { %p947_p5 = pnand %p946_p4, %p942_p2 }
  0x60   : > { %950 = shalt.err (!%p947_p5)
}
  0x61   : > { %797 = dma.hbm_to_vmem [thread:$0]  (!%p1160_p12), %s251_s14, 16, %s253_s1, %s1173_s17  }
  0x62   : > { %s287_s24 = scalar_lea.hbm %s1339_s4, %s1070_s21  ;;  %s284_s13 = scalar_lea.vmem [#allocation10], %s1158_s6 }
  0x63   : > { %s289_s8 = sshll.u32 %s287_s24, 4  ;;  %s291_s10 = sshll.u32 %s284_s13, 4  ;;  %s290_s8 = int_to_ptr.hbm [resolvable:$true] %s289_s8  ;;  %s292_s10 = int_to_ptr.vmem [resolvable:$true] %s291_s10 }
  0x64   : > { %s966_s3 = sshra.s32 %s290_s8, 4  ;;  %s973_s17 = scalar_lea.hbm %s1339_s4, 4  ;;  %s967_s3 = int_to_ptr.hbm [resolvable:$true] %s966_s3 }
  0x65   : > { %s968_s30 = scalar_lea.hbm %s967_s3, 1  ;;  %p974_p2 = scmp.lt.s32.totalorder %s967_s3, %s1339_s4 }
  0x66   : > { %p969_p7 = scmp.ne.s32.totalorder %s967_s3, %s968_s30  ;;  %p975_p13 = scmp.lt.s32.totalorder %s973_s17, %s968_s30 }
  0x68   : > { %p971_p8 = pnand %p969_p7, %p1177_p1  ;;  %p976_p3 = por %p975_p13, %p974_p2 }
  0x6a   : > { %p972_p9 = pneg %p971_p8 }
  0x6c   : > { %p977_p4 = pnand %p976_p3, %p972_p9 }
  0x6e   : > { %980 = shalt.err (!%p977_p4)
}
  0x6f   : > { %803 = dma.hbm_to_vmem [thread:$0]  (!%p1160_p12), %s290_s8, 16, %s292_s10, %s1209_s15  }
  0x70   : > { %300 = sbr.rel (%p1200_p0) target bundleno = 404 (0x194), region = 40  ;;  %s1276_s6 = sand.u32 (!%p1200_p0), 1, %s1062_s19  }
  0x71   : > { %s705_s26 = sshll.u32 (!%p1200_p0), %s1276_s6, 3  ;;  %s303_s16 = scalar_lea.sflag (!%p1200_p0), [#allocation3], %s1276_s6 }
  0x72   : > { %s306_s25 = scalar_lea.vmem (!%p1200_p0), [#allocation2], %s705_s26 }
  0x75   : > { %1041 = dma.done.wait (%p1143_p6), %s303_s16, 128  }
  0x76   : > { %1043 = vsyncadd (%p1143_p6), %s303_s16, 4294967168  ;;  %s312_s7 = sand.u32 1, %s1125_s22   ;;  %s706_s9 = sshll.u32 %s1276_s6, 5 }
  0x77   : > { %s313_s15 = scalar_lea.sflag [#allocation6], %s312_s7  ;;  %s316_s23 = scalar_lea.vmem [#allocation5], %s706_s9 }
  0x78   : > { %1045 = dma.done.wait (%p1143_p6), %s313_s15, 528  }
  0x79   : > { %1047 = vsyncadd (%p1143_p6), %s313_s15, 4294966768  ;;  %s707_s11 = sshll.u32 %s1276_s6, 6  ;;  %s325_s12 = scalar_lea.vmem [#allocation7], %s1276_s6 }
  0x7a   : > { %s332_s24 = scalar_lea.sflag [#allocation9], %s312_s7  ;;  %s335_s8 = scalar_lea.vmem [#allocation8], %s707_s11 }
  0x7b   : > { %1049 = dma.done.wait (%p1143_p6), %s332_s24, 1040  }
  0x7c   : > { %1051 = vsyncadd (%p1143_p6), %s332_s24, 4294966256  ;;  %v767_v0 = vld [vmem:[%s316_s23 + $0x18] sm:$0xff]  ;;  %v766_v2 = vld [vmem:[%s316_s23 + $0x10] sm:$0xff]  ;;  %vm429_vm0 = vcmask 523264   ;;  %s344_s28 = scalar_lea.vmem [#allocation10], %s1276_s6  ;;  %s759_s13 = sshll.u32 %s1125_s22, 3 }
  0x7d   : > { %v775_v1 = vld [vmem:[%s335_s8 + $0x38] sm:$0xff]  ;;  %437 = vmatpush.bf16.msra.mxu0 %v767_v0  ;;  %v774_v3 = vld [vmem:[%s335_s8 + $0x30] sm:$0xff]  ;;  %v765_v4 = vld [vmem:[%s316_s23 + $0x8] sm:$0xff]  ;;  %s540_s30 = scalar_lea.hbm %s1340_s5, %s759_s13  ;;  %s389_s27 = scalar_lea.vmem [#allocation11], %s705_s26 }
  0x7e   : > { %515 = vmatpush.bf16.msra.mxu1 %v775_v1  ;;  %v773_v5 = vld [vmem:[%s335_s8 + $0x28] sm:$0xff]  ;;  %v764_v6 = vld [vmem:[%s316_s23] sm:$0xff]  ;;  %v770_v11 = vld [vmem:[%s335_s8 + $0x10] sm:$0xff]  ;;  %s542_s20 = sshll.u32 %s389_s27, 4  ;;  %s544_s17 = sshll.u32 %s540_s30, 4  ;;  %s543_s20 = int_to_ptr.vmem [resolvable:$true] %s542_s20  ;;  %s545_s17 = int_to_ptr.hbm [resolvable:$true] %s544_s17 }
  0x7f   : > { %v391_v7 = vld [vmem:[%s306_s25] sm:$0xff]  ;;  %v772_v8 = vld [vmem:[%s335_s8 + $0x20] sm:$0xff]  ;;  %s530_s14 = scalar_lea.sflag [#allocation4], %s1276_s6  ;;  %s1010_s1 = sshra.s32 %s545_s17, 4  ;;  %s1011_s1 = int_to_ptr.hbm [resolvable:$true] %s1010_s1 }
  0x80   : > { %v392_v9 = vpack.c.bf16 %v391_v7, %v391_v7  ;;  %v771_v10 = vld [vmem:[%s335_s8 + $0x18] sm:$0xff]  ;;  %v769_v12 = vld [vmem:[%s335_s8 + $0x8] sm:$0xff]  ;;  %v768_v13 = vld [vmem:[%s335_s8] sm:$0xff]  ;;  %s1012_s16 = scalar_lea.hbm %s1011_s1, 8  ;;  %s1016_s7 = scalar_lea.hbm %s1340_s5, 32 }
  0x81   : > { %438 = vmatpush.bf16.msra.mxu0 %v766_v2  ;;  %v844_v14 = vld [vmem:[%s325_s12] ss:$0 sm:$0xff]  ;;  %p1013_p6 = scmp.ne.s32.totalorder %s1011_s1, %s1012_s16  ;;  %p1017_p0 = scmp.lt.s32.totalorder %s1011_s1, %s1340_s5 }
  0x82   : > { %516 = vmatpush.bf16.msra.mxu1 %v774_v3  ;;  %v845_v19 = vld [vmem:[%s344_s28] ss:$0 sm:$0xff]  ;;  %p1018_p5 = scmp.lt.s32.totalorder %s1016_s7, %s1012_s16 }
  0x83   : > { %p1014_p12 = pnand %p1013_p6, %p1149_p10 }
  0x84   : > { %p1019_p7 = por %p1018_p5, %p1017_p0 }
  0x85   : > { %439 = vmatpush.bf16.msra.mxu0 %v765_v4  ;;  %p1015_p1 = pneg %p1014_p12 }
  0x86   : > { %517 = vmatpush.bf16.msra.mxu1 %v773_v5 }
  0x87   : > { %p1020_p8 = pnand %p1019_p7, %p1015_p1 }
  0x89   : > { %440 = vmatpush.bf16.msra.mxu0 %v764_v6 }
  0x8a   : > { %518 = vmatpush.bf16.msra.mxu1 %v772_v8 }
  0x8c   : > { %725 = vmatmul.msk.bf16.vlgmr.msra.gmra.mxu0 %vm429_vm0, %v392_v9 }
  0x8e   : > { %519 = vmatpush.bf16.msra.mxu1 %v771_v10 }
  0x92   : > { %520 = vmatpush.bf16.msra.mxu1 %v770_v11 }
  0x96   : > { %521 = vmatpush.bf16.msra.mxu1 %v769_v12 }
  0x9a   : > { %522 = vmatpush.bf16.msra.mxu1 %v768_v13 }
 0x109   : > { %v442_v15 = vpop.f32.mrf.mxu0 }
 0x10a   : > { %v443_v16 = vadd.f32 %v844_v14, %v442_v15 }
 0x10c   : > { %v446_v17 = vpack.c.bf16 %v443_v16, %v443_v16 }
 0x10e   : > { %523 = vmatmul.bf16.vlgmr.msra.gmra.mxu1 %v446_v17 }
 0x111   : > { %v444_v18 = vpop.f32.mrf.mxu0 }
 0x18b   : > { %v524_v20 = vpop.f32.mrf.mxu1 }
 0x18c   : > { %v525_v21 = vadd.f32 %v845_v19, %v524_v20 }
 0x18e   : > { %528 = vst [vmem:[%s389_s27] sm:$0xff] %v525_v21 }
 0x18f   : > { %1023 = shalt.err (!%p1020_p8)
}
 0x190   : > { %786 = dma.vmem_to_hbm [thread:$0]  (%p1149_p10), %s543_s20, 128, %s545_s17, %s530_s14  }
 0x193   : > { %v526_v22 = vpop.f32.mrf.mxu1 }
 0x194 PF: > { %p809_p9 = scmp.ge.s32.totalorder %s1070_s21, 2  ;;  %s556_s15 = sand.u32 1, %s1058_s18  }
 0x195   : > { %s557_s23 = scalar_lea.sflag [#allocation4], %s556_s15 }
 0x196   : > { %p805_p2 = pnand %p809_p9, %p1153_p11 }
 0x198   : > { %p806_p13 = pneg %p805_p2 }
 0x19a   : > { %1053 = dma.done.wait (%p806_p13), %s557_s23, 128  }
 0x19b   : > { %1055 = vsyncadd (%p806_p13), %s557_s23, 4294967168  ;;  %s1366_s21 = sld [smem:[#allocation17_spill]]  ;;  %s1369_s18 = smov %s1062_s19 }
 0x19c   : > { %s1367_s11 = sld [smem:[#allocation16_spill]] }
 0x19d   : > { %s1368_s20 = sld [smem:[#allocation18_spill]] }
 0x1a1   : > { %p24_p3 = scmp.ge.s32.totalorder %s1366_s21, 6  }
 0x1a2   : > { %s1370_s19 = smov %s1367_s11 }
 0x1a3   :  { %26 = sbr.rel (!%p24_p3) target bundleno = 12 (0xc), region = 133 }
 0x1a8   :  { %563 = vsyncpa [#allocation3], 1 }
 0x1a9   :  { %565 = vsyncpa [#allocation3 + $0x1], 1 }
 0x1aa   :  { %566 = vsyncpa [#allocation6], 1 }
 0x1ab   :  { %568 = vsyncpa [#allocation6 + $0x1], 1 }
 0x1ac   :  { %569 = vsyncpa [#allocation9], 1 }
 0x1ad   :  { %571 = vsyncpa [#allocation9 + $0x1], 1 }
 0x1ae   :  { %572 = vsyncpa [#allocation4], 1 }
 0x1af   :  { %574 = vsyncpa [#allocation4 + $0x1], 1 }

</bundles_post_ra>
